<compile_context>
chip_gen: v7x
topology: tpu7x:2x2x1
jax: 0.10.0
libtpu: 0.0.40
codegen_flags: <defaults>
</compile_context>

<pallas_src>
import jax
import jax.numpy as jnp
from jax.experimental import pallas as pl
from jax.experimental.pallas import tpu as pltpu


C_LANE = 128             # lane width: contraction / channel axes padded to this
USE_BF16_MATMUL = False  # v6e/v7x MXU fast path (conv matmul only); keep False
                         # so the 1e-4 check against the f32 reference passes.


def _mxu(x):
    # Only applied to the big conv im2col matmul operands (f32 accumulation).
    return x.astype(jnp.bfloat16) if USE_BF16_MATMUL else x


# ----------------------------------------------------------------------------
# Fused Pallas kernel: stand-in backbone + exact MisakaNet head
# One grid step == one image (grid axis is "parallel" -> megacore on v7x).
# ----------------------------------------------------------------------------

def _misaka_fused_kernel(patch_ref, wconv_ref, bconv_ref, pool_ref,
                         wpc_ref, bpc_ref, target_ref, o_ref):
    # patch_ref : (HW, 128)    im2col rows of this image (9*Cin -> 128 lanes)
    # wconv_ref : (128, 128)   packed 3x3 conv weight
    # bconv_ref : (1, 128)     conv bias
    # pool_ref  : (1, HW)      GAP row, 1/HW already folded in
    # wpc_ref   : (128, KDIM)  w_proj @ coeff   (rows zero-padded to 128)
    # bpc_ref   : (1, KDIM)    bias @ coeff
    # target_ref: (KDIM, NCLS)
    # o_ref     : (8, NCLS)    result row, broadcast over 8 sublanes

    # --- stand-in backbone: 3x3 conv as ONE packed im2col matmul + ReLU -----
    conv = jnp.dot(_mxu(patch_ref[...]), _mxu(wconv_ref[...]),
                   preferred_element_type=jnp.float32)          # (HW, 128)
    conv = jnp.maximum(conv + bconv_ref[...], 0.0)

    # --- global average pool as a (1,HW)@(HW,128) matmul on the MXU ---------
    pooled = jnp.dot(pool_ref[...], conv,
                     preferred_element_type=jnp.float32)        # (1, 128)

    # --- folded affine head: (feats - bias)@coeff == pooled@Wpc - bpc -------
    x = jnp.dot(pooled, wpc_ref[...],
                preferred_element_type=jnp.float32) - bpc_ref[...]   # (1, KDIM)

    # --- exact MisakaNet tail: L2-normalize (+1e-4) then project on target --
    norm = jnp.sqrt(jnp.sum(x * x, axis=1, keepdims=True))      # (1, 1)
    x = x / (norm + 0.0001)                                     # exact divide
    out = jnp.dot(x, target_ref[...],
                  preferred_element_type=jnp.float32)           # (1, NCLS)
    # NOTE: head matmuls are M=1 per image (latency-only); batch more images
    # per call if head throughput ever matters.
    o_ref[...] = jnp.broadcast_to(out, o_ref.shape)


# ----------------------------------------------------------------------------
# Wrapper: layout plumbing + algebraic folding, then one pallas_call
# ----------------------------------------------------------------------------

def misaka_forward(x_nchw, params):
    B, C, H, W = x_nchw.shape
    HW = H * W
    c_conv = params["w_conv"].shape[-1]
    kdim = params["coeff"].shape[-1]
    n_cls = params["target"].shape[-1]
    k_im2col = 9 * C
    assert k_im2col <= C_LANE and c_conv <= C_LANE

    # Transpose FIRST (un-padded channels), then pad spatially.
    x_nhwc = x_nchw.astype(jnp.float32).transpose(0, 2, 3, 1)       # (B,H,W,C)
    xp = jnp.pad(x_nhwc, ((0, 0), (1, 1), (1, 1), (0, 0)))          # (B,H+2,W+2,C)

    # im2col patch matrix (B, HW, 9C), lane-padded on the contraction axis.
    taps = [xp[:, dy:dy + H, dx:dx + W, :] for dy in range(3) for dx in range(3)]
    patches = jnp.concatenate(taps, axis=-1).reshape(B, HW, k_im2col)
    patches = jnp.pad(patches, ((0, 0), (0, 0), (0, C_LANE - k_im2col)))

    # Packed conv weight (9C, Cc) -> (128, 128); bias -> (1, 128).
    wconv = jnp.pad(params["w_conv"].reshape(k_im2col, c_conv),
                    ((0, C_LANE - k_im2col), (0, C_LANE - c_conv)))
    bconv = jnp.pad(params["b_conv"].reshape(1, c_conv),
                    ((0, 0), (0, C_LANE - c_conv)))

    # Constant pooling row with the 1/HW mean folded in.
    pool = jnp.full((1, HW), 1.0 / HW, dtype=jnp.float32)

    # Fold the affine head: Wpc = w_proj @ coeff, bpc = bias @ coeff (exact).
    wpc = jnp.pad(params["w_proj"] @ params["coeff"],
                  ((0, C_LANE - c_conv), (0, 0)))                   # (128, KDIM)
    bpc = (params["bias"] @ params["coeff"]).reshape(1, kdim)       # (1, KDIM)

    grid_spec = pltpu.PrefetchScalarGridSpec(
        num_scalar_prefetch=0,
        grid=(B,),
        in_specs=[
            pl.BlockSpec((None, HW, C_LANE), lambda b: (b, 0, 0)),  # patches
            pl.BlockSpec((C_LANE, C_LANE), lambda b: (0, 0)),       # wconv
            pl.BlockSpec((1, C_LANE), lambda b: (0, 0)),            # bconv
            pl.BlockSpec((1, HW), lambda b: (0, 0)),                # pool
            pl.BlockSpec((C_LANE, kdim), lambda b: (0, 0)),         # wpc
            pl.BlockSpec((1, kdim), lambda b: (0, 0)),              # bpc
            pl.BlockSpec((kdim, n_cls), lambda b: (0, 0)),          # target
        ],
        # (8, NCLS) per image keeps the output block (8,128)-aligned and
        # lane-dense (unmasked stores); row 0 is the real result.
        out_specs=pl.BlockSpec((None, 8, n_cls), lambda b: (b, 0, 0)),
    )

    out = pl.pallas_call(
        _misaka_fused_kernel,
        out_shape=jax.ShapeDtypeStruct((B, 8, n_cls), jnp.float32),
        grid_spec=grid_spec,
        compiler_params=pltpu.CompilerParams(
            dimension_semantics=("parallel",),          # megacore split on v7x
            vmem_limit_bytes=32 * 1024 * 1024),         # headroom under v7x 64MiB
    )(patches, wconv, bconv, pool, wpc, bpc, params["target"])

    return out[:, 0, :]


# ----------------------------------------------------------------------------
# Reference (plain JAX, unfolded) for correctness checking
# ----------------------------------------------------------------------------

def misaka_forward_ref(x_nchw, params):
    B, C, H, W = x_nchw.shape
    xp = jnp.pad(x_nchw.astype(jnp.float32),
                 ((0, 0), (0, 0), (1, 1), (1, 1))).transpose(0, 2, 3, 1)
    acc = 0.0
    for dy in range(3):
        for dx in range(3):
            tap = xp[:, dy:dy + H, dx:dx + W, :].reshape(B * H * W, C)
            acc = acc + tap @ params["w_conv"][dy * 3 + dx]
    conv = jnp.maximum(acc + params["b_conv"].reshape(1, -1), 0.0)
    pooled = conv.reshape(B, H * W, -1).mean(axis=1)
    feats = pooled @ params["w_proj"]
    x = feats - params["bias"][None, :]
    x = x @ params["coeff"]
    n = jnp.linalg.norm(x, axis=1, keepdims=True)
    x = x / (n + 0.0001)
    return x @ params["target"]


# ----------------------------------------------------------------------------
# Main
# ----------------------------------------------------------------------------

if __name__ == "__main__":
    # Small shapes consistent with the module's forward (image in, logits out).
    B, C_IN, H, W = 2, 3, 16, 16     # image input (NCHW)
    C_CONV = 32                      # stand-in backbone conv width (logical)
    FEAT = 128                       # stand-in for ResNet-50's 2048-d features
    KDIM = 128                       # coeff output dim
    NCLS = 128                       # target / class dim

    root = jax.random.PRNGKey(0)
    k_x, k_wc, k_bc, k_wp, k_bias, k_coeff, k_tgt = jax.random.split(root, 7)

    x = jax.random.normal(k_x, (B, C_IN, H, W), dtype=jnp.float32)

    params = {
        # stand-in backbone weights (per-tap layout: (9, C_in, C_conv))
        "w_conv": 0.1 * jax.random.normal(k_wc, (9, C_IN, C_CONV), jnp.float32),
        "b_conv": 0.1 * jax.random.normal(k_bc, (C_CONV,), jnp.float32),
        "w_proj": 0.1 * jax.random.normal(k_wp, (C_CONV, FEAT), jnp.float32),
        # MisakaNet frozen parameters (synthetic, deterministic):
        "bias":   0.05 * jax.random.normal(k_bias, (FEAT,), jnp.float32),
        "coeff":  0.1 * jax.random.normal(k_coeff, (FEAT, KDIM), jnp.float32),
        # target = generatePedcc_adamw(...).t() -> synthetic (KDIM, NCLS)
        "target": 0.1 * jax.random.normal(k_tgt, (KDIM, NCLS), jnp.float32),
    }

    fwd = jax.jit(misaka_forward)
    out = jax.block_until_ready(fwd(x, params))

    ref = misaka_forward_ref(x, params)
    assert out.shape == (B, NCLS)
    assert jnp.allclose(out, ref, atol=1e-4, rtol=1e-4), "mismatch vs reference"

    print("KERNEL_OK")
</pallas_src>

<mosaic_0001>
module attributes {stable_mosaic.version = 11 : i64} {
  func.func @_misaka_fused_kernel(%arg0: i32, %arg1: memref<1x256x128xf32, #tpu.memory_space<vmem>>, %arg2: memref<128x128xf32, #tpu.memory_space<vmem>>, %arg3: memref<1x128xf32, #tpu.memory_space<vmem>>, %arg4: memref<1x256xf32, #tpu.memory_space<vmem>>, %arg5: memref<128x128xf32, #tpu.memory_space<vmem>>, %arg6: memref<1x128xf32, #tpu.memory_space<vmem>>, %arg7: memref<128x128xf32, #tpu.memory_space<vmem>>, %arg8: memref<1x8x128xf32, #tpu.memory_space<vmem>>) attributes {dimension_semantics = [#tpu.dimension_semantics<parallel>], iteration_bounds = array<i64: 2>, scalar_prefetch = 0 : i64, scratch_operands = 0 : i64, tpu.core_type = #tpu.core_type<tc>, window_params = [{transform_indices = @transform_0, window_bounds = array<i64: 1, 256, 128>}, {pipeline_mode = #tpu.pipeline_mode<synchronous>, transform_indices = @transform_1, window_bounds = array<i64: 128, 128>}, {pipeline_mode = #tpu.pipeline_mode<synchronous>, transform_indices = @transform_2, window_bounds = array<i64: 1, 128>}, {pipeline_mode = #tpu.pipeline_mode<synchronous>, transform_indices = @transform_3, window_bounds = array<i64: 1, 256>}, {pipeline_mode = #tpu.pipeline_mode<synchronous>, transform_indices = @transform_4, window_bounds = array<i64: 128, 128>}, {pipeline_mode = #tpu.pipeline_mode<synchronous>, transform_indices = @transform_5, window_bounds = array<i64: 1, 128>}, {pipeline_mode = #tpu.pipeline_mode<synchronous>, transform_indices = @transform_6, window_bounds = array<i64: 128, 128>}, {transform_indices = @transform_7, window_bounds = array<i64: 1, 8, 128>}]} {
    %c0 = arith.constant 0 : index
    %c0_0 = arith.constant 0 : index
    %c0_1 = arith.constant 0 : index
    %0 = vector.load %arg1[%c0, %c0_0, %c0_1] : memref<1x256x128xf32, #tpu.memory_space<vmem>>, vector<1x256x128xf32>
    %1 = vector.shape_cast %0 : vector<1x256x128xf32> to vector<256x128xf32>
    %c0_2 = arith.constant 0 : index
    %c0_3 = arith.constant 0 : index
    %2 = vector.load %arg2[%c0_2, %c0_3] : memref<128x128xf32, #tpu.memory_space<vmem>>, vector<128x128xf32>
    %cst = arith.constant dense<0.000000e+00> : vector<256x128xf32>
    %3 = tpu.matmul %1, %2, %cst {dimension_numbers = #tpu.dot_dimension_numbers<[1], [0], [0], [1], [0, 0, 1, 1], [], []>} : vector<256x128xf32>, vector<128x128xf32>, vector<256x128xf32> -> vector<256x128xf32>
    %c0_4 = arith.constant 0 : index
    %c0_5 = arith.constant 0 : index
    %4 = vector.load %arg3[%c0_4, %c0_5] : memref<1x128xf32, #tpu.memory_space<vmem>>, vector<1x128xf32>
    %5 = vector.broadcast %4 : vector<1x128xf32> to vector<256x128xf32>
    %6 = arith.addf %3, %5 : vector<256x128xf32>
    %cst_6 = arith.constant 0.000000e+00 : f32
    %7 = vector.broadcast %cst_6 : f32 to vector<256x128xf32>
    %8 = arith.maximumf %6, %7 : vector<256x128xf32>
    %c0_7 = arith.constant 0 : index
    %c0_8 = arith.constant 0 : index
    %9 = vector.load %arg4[%c0_7, %c0_8] : memref<1x256xf32, #tpu.memory_space<vmem>>, vector<1x256xf32>
    %cst_9 = arith.constant dense<0.000000e+00> : vector<1x128xf32>
    %10 = tpu.matmul %9, %8, %cst_9 {dimension_numbers = #tpu.dot_dimension_numbers<[1], [0], [0], [1], [0, 0, 1, 1], [], []>} : vector<1x256xf32>, vector<256x128xf32>, vector<1x128xf32> -> vector<1x128xf32>
    %c0_10 = arith.constant 0 : index
    %c0_11 = arith.constant 0 : index
    %11 = vector.load %arg5[%c0_10, %c0_11] : memref<128x128xf32, #tpu.memory_space<vmem>>, vector<128x128xf32>
    %cst_12 = arith.constant dense<0.000000e+00> : vector<1x128xf32>
    %12 = tpu.matmul %10, %11, %cst_12 {dimension_numbers = #tpu.dot_dimension_numbers<[1], [0], [0], [1], [0, 0, 1, 1], [], []>} : vector<1x128xf32>, vector<128x128xf32>, vector<1x128xf32> -> vector<1x128xf32>
    %c0_13 = arith.constant 0 : index
    %c0_14 = arith.constant 0 : index
    %13 = vector.load %arg6[%c0_13, %c0_14] : memref<1x128xf32, #tpu.memory_space<vmem>>, vector<1x128xf32>
    %14 = arith.subf %12, %13 : vector<1x128xf32>
    %15 = arith.mulf %14, %14 : vector<1x128xf32>
    %cst_15 = arith.constant dense<0.000000e+00> : vector<1xf32>
    %16 = vector.multi_reduction <add>, %15, %cst_15 [1] : vector<1x128xf32> to vector<1xf32>
    %17 = vector.shape_cast %16 : vector<1xf32> to vector<1x1xf32>
    %18 = math.sqrt %17 : vector<1x1xf32>
    %cst_16 = arith.constant 9.99999974E-5 : f32
    %19 = vector.broadcast %cst_16 : f32 to vector<1x1xf32>
    %20 = arith.addf %18, %19 : vector<1x1xf32>
    %21 = vector.broadcast %20 : vector<1x1xf32> to vector<1x128xf32>
    %22 = arith.divf %14, %21 : vector<1x128xf32>
    %c0_17 = arith.constant 0 : index
    %c0_18 = arith.constant 0 : index
    %23 = vector.load %arg7[%c0_17, %c0_18] : memref<128x128xf32, #tpu.memory_space<vmem>>, vector<128x128xf32>
    %cst_19 = arith.constant dense<0.000000e+00> : vector<1x128xf32>
    %24 = tpu.matmul %22, %23, %cst_19 {dimension_numbers = #tpu.dot_dimension_numbers<[1], [0], [0], [1], [0, 0, 1, 1], [], []>} : vector<1x128xf32>, vector<128x128xf32>, vector<1x128xf32> -> vector<1x128xf32>
    %25 = vector.shape_cast %24 : vector<1x128xf32> to vector<1x128xf32>
    %26 = vector.broadcast %25 : vector<1x128xf32> to vector<8x128xf32>
    %c0_20 = arith.constant 0 : index
    %c0_21 = arith.constant 0 : index
    %c0_22 = arith.constant 0 : index
    %27 = vector.load %arg8[%c0_20, %c0_21, %c0_22] : memref<1x8x128xf32, #tpu.memory_space<vmem>>, vector<1x8x128xf32>
    %28 = vector.shape_cast %27 : vector<1x8x128xf32> to vector<8x128xf32>
    %29 = vector.shape_cast %26 : vector<8x128xf32> to vector<1x8x128xf32>
    tpu.vector_store %arg8[%c0_20, %c0_21, %c0_22], %29 {strides = array<i32>} : memref<1x8x128xf32, #tpu.memory_space<vmem>>, vector<1x8x128xf32>,
    return
  }
  func.func @transform_0(%arg0: i32) -> (i32, i32, i32) {
    %c0_i32 = arith.constant 0 : i32
    %c0_i32_0 = arith.constant 0 : i32
    %c0_i32_1 = arith.constant 0 : i32
    return %arg0, %c0_i32, %c0_i32_0 : i32, i32, i32
  }
  func.func @transform_1(%arg0: i32) -> (i32, i32) {
    %c0_i32 = arith.constant 0 : i32
    %c0_i32_0 = arith.constant 0 : i32
    %c0_i32_1 = arith.constant 0 : i32
    return %c0_i32, %c0_i32_0 : i32, i32
  }
  func.func @transform_2(%arg0: i32) -> (i32, i32) {
    %c0_i32 = arith.constant 0 : i32
    %c0_i32_0 = arith.constant 0 : i32
    %c0_i32_1 = arith.constant 0 : i32
    return %c0_i32, %c0_i32_0 : i32, i32
  }
  func.func @transform_3(%arg0: i32) -> (i32, i32) {
    %c0_i32 = arith.constant 0 : i32
    %c0_i32_0 = arith.constant 0 : i32
    %c0_i32_1 = arith.constant 0 : i32
    return %c0_i32, %c0_i32_0 : i32, i32
  }
  func.func @transform_4(%arg0: i32) -> (i32, i32) {
    %c0_i32 = arith.constant 0 : i32
    %c0_i32_0 = arith.constant 0 : i32
    %c0_i32_1 = arith.constant 0 : i32
    return %c0_i32, %c0_i32_0 : i32, i32
  }
  func.func @transform_5(%arg0: i32) -> (i32, i32) {
    %c0_i32 = arith.constant 0 : i32
    %c0_i32_0 = arith.constant 0 : i32
    %c0_i32_1 = arith.constant 0 : i32
    return %c0_i32, %c0_i32_0 : i32, i32
  }
  func.func @transform_6(%arg0: i32) -> (i32, i32) {
    %c0_i32 = arith.constant 0 : i32
    %c0_i32_0 = arith.constant 0 : i32
    %c0_i32_1 = arith.constant 0 : i32
    return %c0_i32, %c0_i32_0 : i32, i32
  }
  func.func @transform_7(%arg0: i32) -> (i32, i32, i32) {
    %c0_i32 = arith.constant 0 : i32
    %c0_i32_0 = arith.constant 0 : i32
    %c0_i32_1 = arith.constant 0 : i32
    return %arg0, %c0_i32, %c0_i32_0 : i32, i32, i32
  }
}

</mosaic_0001>

<bundles_post_ra>
// kernel: misaka_forward.1
= control target key start
LH: loop header
LB: loop body
LE: loop exit
PB: predicated region body
PF: predicated region fallthrough
CT: control target
= control target key end

     0   :  { %s1375_s24 = smov 0   ;;  %s1666_s0 = inlined_call_operand.vmem [shape: f32[2,256,128], index: 0, kind: input, shape index: {}]   ;;  %s1667_s1 = inlined_call_operand.vmem [shape: f32[128,128], index: 1, kind: input, shape index: {}]   ;;  %s1668_s2 = inlined_call_operand.vmem [shape: f32[1,128], index: 2, kind: input, shape index: {}]   ;;  %s1669_s3 = inlined_call_operand.vmem [shape: f32[1,256], index: 3, kind: input, shape index: {}]   ;;  %s1670_s4 = inlined_call_operand.vmem [shape: f32[128,128], index: 4, kind: input, shape index: {}]   ;;  %s1671_s5 = inlined_call_operand.vmem [shape: f32[1,128], index: 5, kind: input, shape index: {}]   ;;  %s1672_s6 = inlined_call_operand.vmem [shape: f32[128,128], index: 6, kind: input, shape index: {}]   ;;  %s1673_s7 = inlined_call_operand.vmem [shape: f32[2,8,128], index: 7, kind: output, shape index: {}]  }
   0x1 LB: > { %s918_s25 = sadd.s32 4294967295, %s1330_s24   ;;  %p922_p0 = scmp.ge.s32.totalorder %s1330_s24, 1  ;;  %s1330_s24 = sphi %s1375_s24, %s17_s24  }
   0x2   : > { %p237_p1 = scmp.lt.s32.totalorder %s1330_s24, 3 }
   0x4   : > { %p238_p2 = pnand %p922_p0, %p237_p1 }
   0x5   : > { %v309_v0 = vld [vmem:[%s1667_s1] sm:$0xff] (!%p238_p2)  ;;  %v310_v1 = vld [vmem:[%s1667_s1 + $0x8] sm:$0xff] (!%p238_p2)  ;;  %v311_v2 = vld [vmem:[%s1667_s1 + $0x10] sm:$0xff] (!%p238_p2)  ;;  %p268_p3 = scmp.lt.s32.totalorder (!%p238_p2), %s918_s25, 1  ;;  %v591_v56 = vlaneseq (!%p238_p2)  ;;  %v1332_v61 = vmov (!%p238_p2), 0.0|0.0   ;;  %vm1333_vm0 = vmmov (!%p238_p2), 0  }
   0x6   : > { %241 = sbr.rel (%p238_p2) target bundleno = 1142 (0x476), region = 48  ;;  %v1197_v3 = vpack.c.bf16 (!%p238_p2), %v310_v1, %v309_v0  ;;  %v312_v4 = vld [vmem:[%s1667_s1 + $0x18] sm:$0xff] (!%p238_p2)  ;;  %v313_v6 = vld [vmem:[%s1667_s1 + $0x20] sm:$0xff] (!%p238_p2)  ;;  %v314_v7 = vld [vmem:[%s1667_s1 + $0x28] sm:$0xff] (!%p238_p2)  ;;  %vm760_vm1 = vcmask (!%p238_p2), 1040384  }
   0x7   : > { %v1201_v5 = vpack.c.bf16 (!%p238_p2), %v312_v4, %v311_v2  ;;  %v1205_v8 = vpack.c.bf16 (!%p238_p2), %v314_v7, %v313_v6  ;;  %v315_v9 = vld [vmem:[%s1667_s1 + $0x30] sm:$0xff] (!%p238_p2)  ;;  %v316_v10 = vld [vmem:[%s1667_s1 + $0x38] sm:$0xff] (!%p238_p2)  ;;  %v317_v13 = vld [vmem:[%s1667_s1 + $0x40] sm:$0xff] (!%p238_p2)  ;;  %v1471_v57 = vshrl.u32 (!%p238_p2), %v591_v56, 7 }
   0x8   : > { %1198 = vmatprep.subr.bf16.mxu0 (!%p238_p2), %v1197_v3  ;;  %v1209_v12 = vpack.c.bf16 (!%p238_p2), %v316_v10, %v315_v9  ;;  %v318_v14 = vld [vmem:[%s1667_s1 + $0x48] sm:$0xff] (!%p238_p2)  ;;  %v319_v16 = vld [vmem:[%s1667_s1 + $0x50] sm:$0xff] (!%p238_p2)  ;;  %v320_v17 = vld [vmem:[%s1667_s1 + $0x58] sm:$0xff] (!%p238_p2) }
   0x9   : > { %1200 = vmatpush3.bf16.msra.mxu0 (!%p238_p2), %v1197_v3  ;;  %v1213_v15 = vpack.c.bf16 (!%p238_p2), %v318_v14, %v317_v13  ;;  %v1217_v18 = vpack.c.bf16 (!%p238_p2), %v320_v17, %v319_v16  ;;  %v321_v19 = vld [vmem:[%s1667_s1 + $0x60] sm:$0xff] (!%p238_p2)  ;;  %v322_v20 = vld [vmem:[%s1667_s1 + $0x68] sm:$0xff] (!%p238_p2)  ;;  %v323_v22 = vld [vmem:[%s1667_s1 + $0x70] sm:$0xff] (!%p238_p2)  ;;  %v597_v58 = vsub.s32 (!%p238_p2), 1, %v1471_v57 }
   0xa   : > { %1202 = vmatprep.subr.bf16.mxu0 (!%p238_p2), %v1201_v5  ;;  %v1221_v21 = vpack.c.bf16 (!%p238_p2), %v322_v20, %v321_v19  ;;  %v324_v23 = vld [vmem:[%s1667_s1 + $0x78] sm:$0xff] (!%p238_p2)  ;;  %v1477_v59 = vld [vmem:[%s1669_s3] sm:$0x3] (!%p238_p2) }
   0xb   : > { %v1225_v24 = vpack.c.bf16 (!%p238_p2), %v324_v23, %v323_v22  ;;  %v598_v60 = vrot.slane (!%p238_p2), %v1477_v59, %v597_v58  ;;  %v1484_v62 = vld [vmem:[%s1668_s2] ss:$0 sm:$0xff] (!%p238_p2) }
   0xd   : > { %s1675_s25 = smov (!%p268_p3, %s918_s25), 1  ;;  %1204 = vmatpush3.bf16.msra.mxu0 %v1201_v5  ;;  %665 = vmatprep.mubr.f32.mxu1 %v598_v60 }
   0xe   : > { %s929_s15 = sshll.u32 %s1675_s25, 8  ;;  %1206 = vmatprep.subr.bf16.mxu0 %v1205_v8  ;;  %s925_s27 = sshll.u32 %s1675_s25, 3 }
   0xf   : > { %s1407_s18 = scalar_lea.vmem %s1666_s0, %s929_s15  ;;  %s276_s30 = scalar_lea.vmem %s1673_s7, %s925_s27 }
  0x10   : > { %v277_v11 = vld [vmem:[%s1407_s18] sm:$0xff]  ;;  %v278_v25 = vld [vmem:[%s1407_s18 + $0x8] sm:$0xff]  ;;  %v279_v26 = vld [vmem:[%s1407_s18 + $0x10] sm:$0xff] }
  0x11   : > { %1079 = vmatprep.mubr.f32.mxu0 %v277_v11  ;;  %1208 = vmatpush3.bf16.msra.mxu0 %v1205_v8  ;;  %v280_v27 = vld [vmem:[%s1407_s18 + $0x18] sm:$0xff]  ;;  %v281_v28 = vld [vmem:[%s1407_s18 + $0x20] sm:$0xff]  ;;  %v282_v29 = vld [vmem:[%s1407_s18 + $0x28] sm:$0xff] }
  0x12   : > { %1210 = vmatprep.subr.bf16.mxu0 %v1209_v12  ;;  %v283_v30 = vld [vmem:[%s1407_s18 + $0x30] sm:$0xff]  ;;  %v284_v31 = vld [vmem:[%s1407_s18 + $0x38] sm:$0xff]  ;;  %v285_v32 = vld [vmem:[%s1407_s18 + $0x40] sm:$0xff] }
  0x13   : > { %v286_v33 = vld [vmem:[%s1407_s18 + $0x48] sm:$0xff]  ;;  %v287_v34 = vld [vmem:[%s1407_s18 + $0x50] sm:$0xff]  ;;  %v288_v35 = vld [vmem:[%s1407_s18 + $0x58] sm:$0xff] }
  0x14   : > { %v289_v36 = vld [vmem:[%s1407_s18 + $0x60] sm:$0xff]  ;;  %v290_v37 = vld [vmem:[%s1407_s18 + $0x68] sm:$0xff]  ;;  %v291_v38 = vld [vmem:[%s1407_s18 + $0x70] sm:$0xff] }
  0x15   : > { %1212 = vmatpush3.bf16.msra.mxu0 %v1209_v12  ;;  %v292_v39 = vld [vmem:[%s1407_s18 + $0x78] sm:$0xff]  ;;  %v293_v40 = vld [vmem:[%s1407_s18 + $0x80] sm:$0xff]  ;;  %v294_v41 = vld [vmem:[%s1407_s18 + $0x88] sm:$0xff] }
  0x16   : > { %1214 = vmatprep.subr.bf16.mxu0 %v1213_v15  ;;  %v295_v42 = vld [vmem:[%s1407_s18 + $0x90] sm:$0xff]  ;;  %v296_v43 = vld [vmem:[%s1407_s18 + $0x98] sm:$0xff]  ;;  %v297_v44 = vld [vmem:[%s1407_s18 + $0xa0] sm:$0xff] }
  0x17   : > { %v298_v45 = vld [vmem:[%s1407_s18 + $0xa8] sm:$0xff]  ;;  %v299_v46 = vld [vmem:[%s1407_s18 + $0xb0] sm:$0xff]  ;;  %v300_v47 = vld [vmem:[%s1407_s18 + $0xb8] sm:$0xff] }
  0x18   : > { %v301_v48 = vld [vmem:[%s1407_s18 + $0xc0] sm:$0xff]  ;;  %v302_v49 = vld [vmem:[%s1407_s18 + $0xc8] sm:$0xff]  ;;  %v303_v50 = vld [vmem:[%s1407_s18 + $0xd0] sm:$0xff] }
  0x19   : > { %1216 = vmatpush3.bf16.msra.mxu0 %v1213_v15  ;;  %v304_v51 = vld [vmem:[%s1407_s18 + $0xd8] sm:$0xff]  ;;  %v305_v52 = vld [vmem:[%s1407_s18 + $0xe0] sm:$0xff]  ;;  %v306_v53 = vld [vmem:[%s1407_s18 + $0xe8] sm:$0xff] }
  0x1a   : > { %1218 = vmatprep.subr.bf16.mxu0 %v1217_v18  ;;  %v307_v54 = vld [vmem:[%s1407_s18 + $0xf0] sm:$0xff]  ;;  %v308_v55 = vld [vmem:[%s1407_s18 + $0xf8] sm:$0xff] }
  0x1d   : > { %1220 = vmatpush3.bf16.msra.mxu0 %v1217_v18 }
  0x1e   : > { %1222 = vmatprep.subr.bf16.mxu0 %v1221_v21 }
  0x21   : > { %1224 = vmatpush3.bf16.msra.mxu0 %v1221_v21 }
  0x22   : > { %1226 = vmatprep.subr.bf16.mxu0 %v1225_v24 }
  0x25   : > { %1228 = vmatpush3.bf16.msra.mxu0 %v1225_v24 }
  0x26   : > { %1285 = vmatprep.subr.bf16.mxu0 %v1332_v61 }
  0x28   : > { %1080 = vmatmul.mubr.f32.vlgmr.msra.gmra.mrb[0].mxu0 %v278_v25 }
  0x29   : > { %1082 = vmatprep.mubr.f32.mxu0 %v279_v26 }
  0x2c   : > { %1083 = vmatmul.mubr.f32.gmra.mrb[2].mxu0 %v280_v27 }
  0x2d   : > { %1085 = vmatprep.mubr.f32.mxu0 %v281_v28 }
  0x30   : > { %1086 = vmatmul.mubr.f32.gmra.mrb[4].mxu0 %v282_v29 }
  0x31   : > { %1088 = vmatprep.mubr.f32.mxu0 %v283_v30 }
  0x34   : > { %1089 = vmatmul.mubr.f32.gmra.mrb[6].mxu0 %v284_v31 }
  0x35   : > { %1091 = vmatprep.mubr.f32.mxu0 %v285_v32 }
  0x38   : > { %1092 = vmatmul.mubr.f32.gmra.mrb[8].mxu0 %v286_v33 }
  0x39   : > { %1094 = vmatprep.mubr.f32.mxu0 %v287_v34 }
  0x3c   : > { %1095 = vmatmul.mubr.f32.gmra.mrb[10].mxu0 %v288_v35 }
  0x3d   : > { %1097 = vmatprep.mubr.f32.mxu0 %v289_v36 }
  0x40   : > { %1098 = vmatmul.mubr.f32.gmra.mrb[12].mxu0 %v290_v37 }
  0x41   : > { %1100 = vmatprep.mubr.f32.mxu0 %v291_v38 }
  0x44   : > { %1101 = vmatmul.mubr.f32.gmra.mrb[14].mxu0 %v292_v39 }
  0x45   : > { %1103 = vmatprep.mubr.f32.mxu0 %v293_v40 }
  0x48   : > { %1104 = vmatmul.mubr.f32.gmra.mrb[16].mxu0 %v294_v41 }
  0x49   : > { %1106 = vmatprep.mubr.f32.mxu0 %v295_v42 }
  0x4c   : > { %1107 = vmatmul.mubr.f32.gmra.mrb[18].mxu0 %v296_v43 }
  0x4d   : > { %1109 = vmatprep.mubr.f32.mxu0 %v297_v44 }
  0x50   : > { %1110 = vmatmul.mubr.f32.gmra.mrb[20].mxu0 %v298_v45 }
  0x51   : > { %1112 = vmatprep.mubr.f32.mxu0 %v299_v46 }
  0x54   : > { %1113 = vmatmul.mubr.f32.gmra.mrb[22].mxu0 %v300_v47 }
  0x55   : > { %1115 = vmatprep.mubr.f32.mxu0 %v301_v48 }
  0x58   : > { %1116 = vmatmul.mubr.f32.gmra.mrb[24].mxu0 %v302_v49 }
  0x59   : > { %1118 = vmatprep.mubr.f32.mxu0 %v303_v50 }
  0x5c   : > { %1119 = vmatmul.mubr.f32.gmra.mrb[26].mxu0 %v304_v51 }
  0x5d   : > { %1121 = vmatprep.mubr.f32.mxu0 %v305_v52 }
  0x60   : > { %1122 = vmatmul.mubr.f32.gmra.mrb[28].mxu0 %v306_v53 }
  0x61   : > { %1124 = vmatprep.mubr.f32.mxu0 %v307_v54 }
  0x64   : > { %1125 = vmatmul.mubr.f32.gmra.mrb[30].mxu0 %v308_v55 }
  0xfb   : > { %v1081_v63 = vpop.f32.mrb[0].mxu0 }
  0xfc   : > { %v404_v0 = vadd.f32 %v1081_v63, %v1484_v62  ;;  %v398_v1 = vpop.f32.mrb[1].mxu0 }
  0xfd   : > { %v399_v2 = vadd.f32 %v1484_v62, %v398_v1 }
  0xfe   : > { %v558_v3 = vmax.f32 %v404_v0, 0.0 }
  0xff   : > { %v557_v4 = vmax.f32 %v399_v2, 0.0  ;;  %v1084_v5 = vpop.f32.mrb[2].mxu0 }
 0x100   : > { %v414_v6 = vadd.f32 %v1084_v5, %v1484_v62  ;;  %v408_v7 = vpop.f32.mrb[3].mxu0 }
 0x101   : > { %v409_v8 = vadd.f32 %v1484_v62, %v408_v7  ;;  %v1231_v9 = vpack.c.bf16 %v558_v3, %v557_v4 }
 0x102   : > { %v560_v10 = vmax.f32 %v414_v6, 0.0 }
 0x103   : > { %v559_v11 = vmax.f32 %v409_v8, 0.0  ;;  %v1087_v12 = vpop.f32.mrb[4].mxu0 }
 0x104   : > { %v424_v13 = vadd.f32 %v1087_v12, %v1484_v62  ;;  %v418_v14 = vpop.f32.mrb[5].mxu0 }
 0x105   : > { %v1491_v15 = vpack.c.bf16 %v560_v10, %v559_v11  ;;  %v419_v16 = vadd.f32 %v1484_v62, %v418_v14 }
 0x106   : > { %v562_v17 = vmax.f32 %v424_v13, 0.0 }
 0x107   : > { %v561_v18 = vmax.f32 %v419_v16, 0.0  ;;  %v1090_v19 = vpop.f32.mrb[6].mxu0 }
 0x108   : > { %v434_v20 = vadd.f32 %v1090_v19, %v1484_v62  ;;  %v428_v21 = vpop.f32.mrb[7].mxu0 }
 0x109   : > { %v1495_v22 = vpack.c.bf16 %v562_v17, %v561_v18  ;;  %v429_v23 = vadd.f32 %v1484_v62, %v428_v21 }
 0x10a   : > { %v564_v24 = vmax.f32 %v434_v20, 0.0 }
 0x10b   : > { %v563_v25 = vmax.f32 %v429_v23, 0.0  ;;  %v1093_v26 = vpop.f32.mrb[8].mxu0 }
 0x10c   : > { %v444_v27 = vadd.f32 %v1093_v26, %v1484_v62  ;;  %v438_v28 = vpop.f32.mrb[9].mxu0 }
 0x10d   : > { %v1499_v29 = vpack.c.bf16 %v564_v24, %v563_v25  ;;  %v439_v30 = vadd.f32 %v1484_v62, %v438_v28 }
 0x10e   : > { %v566_v31 = vmax.f32 %v444_v27, 0.0 }
 0x10f   : > { %v565_v32 = vmax.f32 %v439_v30, 0.0  ;;  %v1096_v33 = vpop.f32.mrb[10].mxu0 }
 0x110   : > { %v454_v34 = vadd.f32 %v1096_v33, %v1484_v62  ;;  %v448_v35 = vpop.f32.mrb[11].mxu0 }
 0x111   : > { %v1503_v36 = vpack.c.bf16 %v566_v31, %v565_v32  ;;  %v449_v37 = vadd.f32 %v1484_v62, %v448_v35 }
 0x112   : > { %v568_v38 = vmax.f32 %v454_v34, 0.0 }
 0x113   : > { %v567_v39 = vmax.f32 %v449_v37, 0.0  ;;  %v1099_v40 = vpop.f32.mrb[12].mxu0 }
 0x114   : > { %v464_v41 = vadd.f32 %v1099_v40, %v1484_v62  ;;  %v458_v42 = vpop.f32.mrb[13].mxu0 }
 0x115   : > { %v1507_v43 = vpack.c.bf16 %v568_v38, %v567_v39  ;;  %v459_v44 = vadd.f32 %v1484_v62, %v458_v42 }
 0x116   : > { %v570_v45 = vmax.f32 %v464_v41, 0.0 }
 0x117   : > { %v569_v46 = vmax.f32 %v459_v44, 0.0  ;;  %v1102_v47 = vpop.f32.mrb[14].mxu0 }
 0x118   : > { %v474_v48 = vadd.f32 %v1102_v47, %v1484_v62  ;;  %v468_v49 = vpop.f32.mrb[15].mxu0 }
 0x119   : > { %v1511_v50 = vpack.c.bf16 %v570_v45, %v569_v46  ;;  %v469_v51 = vadd.f32 %v1484_v62, %v468_v49 }
 0x11a   : > { %v572_v52 = vmax.f32 %v474_v48, 0.0 }
 0x11b   : > { %v571_v53 = vmax.f32 %v469_v51, 0.0  ;;  %v1105_v54 = vpop.f32.mrb[16].mxu0 }
 0x11c   : > { %v484_v55 = vadd.f32 %v1105_v54, %v1484_v62  ;;  %v478_v56 = vpop.f32.mrb[17].mxu0  ;;  %v671_v54 = vld [vmem:[%s1670_s4] sm:$0xff] }
 0x11d   : > { %v1515_v58 = vpack.c.bf16 %v572_v52, %v571_v53  ;;  %v479_v60 = vadd.f32 %v1484_v62, %v478_v56  ;;  %v674_v56 = vld [vmem:[%s1670_s4 + $0x18] sm:$0xff] }
 0x11e   : > { %v574_v63 = vmax.f32 %v484_v55, 0.0  ;;  %v672_v55 = vld [vmem:[%s1670_s4 + $0x8] sm:$0xff] }
 0x11f   : > { %v573_v0 = vmax.f32 %v479_v60, 0.0  ;;  %v1108_v1 = vpop.f32.mrb[18].mxu0 }
 0x120   : > { %v494_v2 = vadd.f32 %v1108_v1, %v1484_v62  ;;  %v488_v3 = vpop.f32.mrb[19].mxu0  ;;  %v678_v1 = vld [vmem:[%s1670_s4 + $0x38] sm:$0xff] }
 0x121   : > { %v489_v4 = vadd.f32 %v1484_v62, %v488_v3  ;;  %v1229_v5 = vpack.c.bf16 %v574_v63, %v573_v0  ;;  %v677_v0 = vld [vmem:[%s1670_s4 + $0x30] sm:$0xff]  ;;  %v679_v3 = vld [vmem:[%s1670_s4 + $0x40] sm:$0xff] }
 0x122   : > { %v576_v6 = vmax.f32 %v494_v2, 0.0  ;;  %v1271_v2 = vpack.c.bf16 %v678_v1, %v677_v0 }
 0x123   : > { %v575_v7 = vmax.f32 %v489_v4, 0.0  ;;  %v1111_v8 = vpop.f32.mrb[20].mxu0  ;;  %1230 = vmatprep.subr.bf16.mxu1 %v1229_v5  ;;  %v680_v4 = vld [vmem:[%s1670_s4 + $0x48] sm:$0xff] }
 0x124   : > { %v504_v10 = vadd.f32 %v1111_v8, %v1484_v62  ;;  %v498_v11 = vpop.f32.mrb[21].mxu0  ;;  %1232 = vmatpush3.bf16.msra.mxu1 %v1231_v9  ;;  %v1274_v5 = vpack.c.bf16 %v680_v4, %v679_v3 }
 0x125   : > { %v1233_v12 = vpack.c.bf16 %v576_v6, %v575_v7  ;;  %v499_v13 = vadd.f32 %v1484_v62, %v498_v11  ;;  %v681_v6 = vld [vmem:[%s1670_s4 + $0x50] sm:$0xff]  ;;  %v682_v7 = vld [vmem:[%s1670_s4 + $0x58] sm:$0xff]  ;;  %v684_v11 = vld [vmem:[%s1670_s4 + $0x68] sm:$0xff] }
 0x126   : > { %v578_v14 = vmax.f32 %v504_v10, 0.0  ;;  %v1277_v8 = vpack.c.bf16 %v682_v7, %v681_v6  ;;  %v683_v10 = vld [vmem:[%s1670_s4 + $0x60] sm:$0xff] }
 0x127   : > { %v577_v16 = vmax.f32 %v499_v13, 0.0  ;;  %v1114_v17 = vpop.f32.mrb[22].mxu0  ;;  %1234 = vmatprep.subr.bf16.mxu1 %v1233_v12  ;;  %v1280_v12 = vpack.c.bf16 %v684_v11, %v683_v10  ;;  %v685_v13 = vld [vmem:[%s1670_s4 + $0x70] sm:$0xff] }
 0x128   : > { %v514_v18 = vadd.f32 %v1114_v17, %v1484_v62  ;;  %v508_v19 = vpop.f32.mrb[23].mxu0  ;;  %1236 = vmatpush3.bf16.msra.mxu1 %v1491_v15  ;;  %v1334_v17 = vmov 0.0  }
 0x129   : > { %v1237_v20 = vpack.c.bf16 %v578_v14, %v577_v16  ;;  %v509_v21 = vadd.f32 %v1484_v62, %v508_v19  ;;  %v686_v14 = vld [vmem:[%s1670_s4 + $0x78] sm:$0xff]  ;;  %1194 = vmatprep.mubr.msk.f32.mxu0 %vm1333_vm0, %v1334_v17 }
 0x12a   : > { %v580_v23 = vmax.f32 %v514_v18, 0.0  ;;  %v1283_v16 = vpack.c.bf16 %v686_v14, %v685_v13 }
 0x12b   : > { %v579_v24 = vmax.f32 %v509_v21, 0.0  ;;  %v1117_v25 = vpop.f32.mrb[24].mxu0  ;;  %1238 = vmatprep.subr.bf16.mxu1 %v1237_v20  ;;  %v774_v21 = vld [vmem:[%s1672_s6] sm:$0xff] }
 0x12c   : > { %v524_v9 = vadd.f32 %v1117_v25, %v1484_v62  ;;  %v518_v26 = vpop.f32.mrb[25].mxu0  ;;  %1240 = vmatpush3.bf16.msra.mxu1 %v1495_v22 }
 0x12d   : > { %v1241_v27 = vpack.c.bf16 %v580_v23, %v579_v24  ;;  %v519_v28 = vadd.f32 %v1484_v62, %v518_v26  ;;  %v775_v23 = vld [vmem:[%s1672_s6 + $0x8] sm:$0xff]  ;;  %v776_v24 = vld [vmem:[%s1672_s6 + $0x10] sm:$0xff] }
 0x12e   : > { %v582_v30 = vmax.f32 %v524_v9, 0.0  ;;  %v1286_v25 = vpack.c.bf16 %v775_v23, %v774_v21  ;;  %v777_v9 = vld [vmem:[%s1672_s6 + $0x18] sm:$0xff] }
 0x12f   : > { %v581_v31 = vmax.f32 %v519_v28, 0.0  ;;  %v1120_v32 = vpop.f32.mrb[26].mxu0  ;;  %1242 = vmatprep.subr.bf16.mxu1 %v1241_v27  ;;  %v1289_v26 = vpack.c.bf16 %v777_v9, %v776_v24  ;;  %v778_v27 = vld [vmem:[%s1672_s6 + $0x20] sm:$0xff]  ;;  %v779_v28 = vld [vmem:[%s1672_s6 + $0x28] sm:$0xff] }
 0x130   : > { %v534_v15 = vadd.f32 %v1120_v32, %v1484_v62  ;;  %v528_v33 = vpop.f32.mrb[27].mxu0  ;;  %1244 = vmatpush3.bf16.msra.mxu1 %v1499_v29  ;;  %1287 = vmatpush3.bf16.msra.mxu0 %v1286_v25  ;;  %v781_v32 = vld [vmem:[%s1672_s6 + $0x38] sm:$0xff] }
 0x131   : > { %v1245_v34 = vpack.c.bf16 %v582_v30, %v581_v31  ;;  %v529_v35 = vadd.f32 %v1484_v62, %v528_v33  ;;  %1288 = vmatprep.subr.bf16.mxu0 %v1332_v61  ;;  %v1292_v30 = vpack.c.bf16 %v779_v28, %v778_v27  ;;  %v780_v31 = vld [vmem:[%s1672_s6 + $0x30] sm:$0xff]  ;;  %v782_v33 = vld [vmem:[%s1672_s6 + $0x40] sm:$0xff] }
 0x132   : > { %v584_v37 = vmax.f32 %v534_v15, 0.0  ;;  %v1295_v15 = vpack.c.bf16 %v781_v32, %v780_v31 }
 0x133   : > { %v583_v38 = vmax.f32 %v529_v35, 0.0  ;;  %v1123_v39 = vpop.f32.mrb[28].mxu0  ;;  %1246 = vmatprep.subr.bf16.mxu1 %v1245_v34  ;;  %v783_v34 = vld [vmem:[%s1672_s6 + $0x48] sm:$0xff] }
 0x134   : > { %v544_v22 = vadd.f32 %v1123_v39, %v1484_v62  ;;  %v538_v40 = vpop.f32.mrb[29].mxu0  ;;  %1248 = vmatpush3.bf16.msra.mxu1 %v1503_v36  ;;  %v593_v36 = vsub.s32 0, %v1471_v57  ;;  %1290 = vmatpush3.bf16.msra.mxu0 %v1289_v26  ;;  %v1298_v35 = vpack.c.bf16 %v783_v34, %v782_v33 }
 0x135   : > { %v1249_v41 = vpack.c.bf16 %v584_v37, %v583_v38  ;;  %v539_v42 = vadd.f32 %v1484_v62, %v538_v40  ;;  %1291 = vmatprep.subr.bf16.mxu0 %v1332_v61  ;;  %v757_v37 = vld [vmem:[%s1671_s5] sm:$0x1] }
 0x136   : > { %v586_v44 = vmax.f32 %v544_v22, 0.0 }
 0x137   : > { %v585_v45 = vmax.f32 %v539_v42, 0.0  ;;  %v1126_v46 = vpop.f32.mrb[30].mxu0  ;;  %1250 = vmatprep.subr.bf16.mxu1 %v1249_v41  ;;  %v784_v42 = vld [vmem:[%s1672_s6 + $0x50] sm:$0xff] }
 0x138   : > { %v554_v29 = vadd.f32 %v1126_v46, %v1484_v62  ;;  %v548_v47 = vpop.f32.mrb[31].mxu0  ;;  %1252 = vmatpush3.bf16.msra.mxu1 %v1507_v43  ;;  %v1262_v43 = vpack.c.bf16 %v672_v55, %v671_v54  ;;  %1293 = vmatpush3.bf16.msra.mxu0 %v1292_v30  ;;  %v786_v46 = vld [vmem:[%s1672_s6 + $0x60] sm:$0xff] }
 0x139   : > { %v1253_v48 = vpack.c.bf16 %v586_v44, %v585_v45  ;;  %v549_v49 = vadd.f32 %v1484_v62, %v548_v47  ;;  %v594_v62 = vrot.slane %v1477_v59, %v593_v36  ;;  %v675_v59 = vld [vmem:[%s1670_s4 + $0x20] sm:$0xff]  ;;  %1294 = vmatprep.subr.bf16.mxu0 %v1332_v61  ;;  %v785_v44 = vld [vmem:[%s1672_s6 + $0x58] sm:$0xff] }
 0x13a   : > { %v588_v51 = vmax.f32 %v554_v29, 0.0  ;;  %v1301_v45 = vpack.c.bf16 %v785_v44, %v784_v42  ;;  %v787_v29 = vld [vmem:[%s1672_s6 + $0x68] sm:$0xff] }
 0x13b   : > { %v587_v52 = vmax.f32 %v549_v49, 0.0  ;;  %1254 = vmatprep.subr.bf16.mxu1 %v1253_v48  ;;  %v1304_v47 = vpack.c.bf16 %v787_v29, %v786_v46  ;;  %v788_v48 = vld [vmem:[%s1672_s6 + $0x70] sm:$0xff]  ;;  %v789_v49 = vld [vmem:[%s1672_s6 + $0x78] sm:$0xff] }
 0x13c   : > { %1256 = vmatpush3.bf16.msra.mxu1 %v1511_v50  ;;  %v673_v50 = vld [vmem:[%s1670_s4 + $0x10] sm:$0xff]  ;;  %1296 = vmatpush3.bf16.msra.mxu0 %v1295_v15 }
 0x13d   : > { %v1257_v53 = vpack.c.bf16 %v588_v51, %v587_v52  ;;  %v1265_v60 = vpack.c.bf16 %v674_v56, %v673_v50  ;;  %1297 = vmatprep.subr.bf16.mxu0 %v1332_v61  ;;  %v1307_v51 = vpack.c.bf16 %v789_v49, %v788_v48 }
 0x13f   : > { %1258 = vmatprep.subr.bf16.mxu1 %v1257_v53 }
 0x140   : > { %1260 = vmatpush3.bf16.msra.mxu1 %v1515_v58  ;;  %v676_v58 = vld [vmem:[%s1670_s4 + $0x28] sm:$0xff]  ;;  %1299 = vmatpush3.bf16.msra.mxu0 %v1298_v35 }
 0x141   : > { %1261 = vmatprep.subr.bf16.mxu1 %v1332_v61  ;;  %v1268_v63 = vpack.c.bf16 %v676_v58, %v675_v59  ;;  %1300 = vmatprep.subr.bf16.mxu0 %v1332_v61 }
 0x143   : > { %666 = vmatmul.mubr.f32.vlgmr.msra.gmra.mrb[0].mxu1 %v594_v62 }
 0x144   : > { %1263 = vmatpush3.bf16.msra.mxu1 %v1262_v43  ;;  %1159 = vmatprep.mubr.msk.f32.mxu1 %vm1333_vm0, %v1334_v17 }
 0x145   : > { %1264 = vmatprep.subr.bf16.mxu1 %v1332_v61  ;;  %1302 = vmatpush3.bf16.msra.mxu0 %v1301_v45 }
 0x146   : > { %1303 = vmatprep.subr.bf16.mxu0 %v1332_v61 }
 0x148   : > { %1266 = vmatpush3.bf16.msra.mxu1 %v1265_v60 }
 0x149   : > { %1267 = vmatprep.subr.bf16.mxu1 %v1332_v61  ;;  %1305 = vmatpush3.bf16.msra.mxu0 %v1304_v47 }
 0x14a   : > { %1306 = vmatprep.subr.bf16.mxu0 %v1332_v61 }
 0x14c   : > { %1269 = vmatpush3.bf16.msra.mxu1 %v1268_v63 }
 0x14d   : > { %1270 = vmatprep.subr.bf16.mxu1 %v1332_v61  ;;  %1308 = vmatpush3.bf16.msra.mxu0 %v1307_v51 }
 0x150   : > { %1272 = vmatpush3.bf16.msra.mxu1 %v1271_v2 }
 0x151   : > { %1273 = vmatprep.subr.bf16.mxu1 %v1332_v61 }
 0x154   : > { %1275 = vmatpush3.bf16.msra.mxu1 %v1274_v5 }
 0x155   : > { %1276 = vmatprep.subr.bf16.mxu1 %v1332_v61 }
 0x158   : > { %1278 = vmatpush3.bf16.msra.mxu1 %v1277_v8 }
 0x159   : > { %1279 = vmatprep.subr.bf16.mxu1 %v1332_v61 }
 0x15c   : > { %1281 = vmatpush3.bf16.msra.mxu1 %v1280_v12 }
 0x15d   : > { %1282 = vmatprep.subr.bf16.mxu1 %v1332_v61 }
 0x160   : > { %1284 = vmatpush3.bf16.msra.mxu1 %v1283_v16 }
 0x216   : > { %v1010_v18 = vpop.f32.mrb[0].mxu1 }
 0x217   : > { %v1011_v19 = vpop.f32.mrb[1].mxu1 }
 0x218   : > { %v1012_v20 = vadd.f32 %v1011_v19, %v1010_v18 }
 0x21a   : > { %1160 = vmatmul.mubr.f32.vlgmr.msra.gmra.mrb[2].mxu1 %v1012_v20 }
 0x2ed   : > { %v753_v38 = vpop.f32.mrb[2].mxu1 }
 0x2ee   : > { %v758_v39 = vsub.f32 %v753_v38, %v757_v37  ;;  %v1161_v22 = vpop.f32.mrb[3].mxu1 }
 0x2f0   : > { %v759_v40 = vmul.f32 %v758_v39, %v758_v39 }
 0x2f2   : > { %v761_v41 = vsel %vm760_vm1, %v759_v40, 0.0 }
 0x2f3   : > { %762 = vadd.xlane.f32.xlu0 %v761_v41 }
 0x380   : > { %v763_v52 = vpop.xlane.xlu0 %762 }
 0x381   : > { %1320 = vrsqrt.f32 %v763_v52  ;;  %vm766_vm2 = vcmp.eq.f32.partialorder %v763_v52, inf  ;;  %v769_v55 = vand.u32 2147483648, %v763_v52  ;;  %vm768_vm3 = vcmp.eq.f32.partialorder %v763_v52, 0.0 }
 0x38b   : > { %v1321_v53 = vpop.eup %1320 }
 0x38c   : > { %v765_v54 = vmul.f32 %v1321_v53, %v763_v52 }
 0x38e   : > { %v767_v62 = vsel %vm766_vm2, %v763_v52, %v765_v54 }
 0x38f   : > { %v770_v43 = vsel %vm768_vm3, %v769_v55, %v767_v62 }
 0x390   : > { %v771_v50 = vadd.f32 0.0001, %v770_v43 }
 0x392   : > { %1322 = vrcp.f32 %v771_v50 }
 0x39c   : > { %v1323_v56 = vpop.eup %1322 }
 0x39d   : > { %v773_v60 = vmul.f32 %v1323_v56, %v758_v39 }
 0x39f   : > { %1195 = vmatmul.mubr.f32.vlgmr.msra.gmra.mrb[32].mxu0 %v773_v60 }
 0x472   : > { %v856_v61 = vpop.f32.mrb[32].mxu0 }
 0x473   : > { %v863_v59 = vrot.slane %v856_v61, %v593_v36  ;;  %v1196_v58 = vpop.f32.mrb[33].mxu0 }
 0x475   : > { %864 = vst [vmem:[%s276_s30] sm:$0xff] %v863_v59 }
 0x476 PF: > { %s17_s24 = sadd.s32 1, %s1330_s24  }
 0x477   : > { %p14_p4 = scmp.ge.s32.totalorder %s17_s24, 4  }
 0x479   :  { %16 = sbr.rel (!%p14_p4) target bundleno = 1 (0x1), region = 78 }

</bundles_post_ra>
